<compile_context>
chip_gen: v7x
topology: tpu7x:2x2x1
jax: 0.10.0
libtpu: 0.0.40
codegen_flags: <defaults>
</compile_context>

<pallas_src>
import jax
import jax.numpy as jnp
from jax import lax
from jax.experimental import pallas as pl
from jax.experimental.pallas import tpu as pltpu

LANE = 128
MIB = 1024 * 1024
_SMALL_CIN_MAX = 32  # <= this: fold all 9 taps into one 128-lane contraction (im2col)


def _round_up(x, m):
    return ((x + m - 1) // m) * m


def _tpu_budget():
    """Returns (vmem_limit_bytes, want_parallel_steps) for the current chip generation."""
    try:
        info = pltpu.get_tpu_info()
        vmem_cap = int(getattr(info, "vmem_capacity_bytes", 64 * MIB))
    except Exception:
        vmem_cap = 64 * MIB
    if vmem_cap <= 96 * MIB:
        # v7x-class: 64 MiB VMEM per TensorCore, 2 TensorCores per chip.
        return min(40 * MIB, (vmem_cap * 5) // 8), True
    # v5e / v6e: 128 MiB VMEM, single TensorCore -> big blocks, no forced grid split.
    return 96 * MIB, False


def _pick_m_tile(m_total, k_p, cout_p, vmem_budget, want_parallel):
    """Rows of the im2col matrix per grid step, sized to the VMEM budget."""
    usable = vmem_budget // 2                                # headroom for compiler scratch
    fixed = k_p * cout_p * 2 + cout_p * 4                    # resident weights (bf16) + bias
    per_row = 2 * k_p * 2 + 2 * cout_p * 2 + cout_p * 4      # dbl-buf x/out (bf16) + f32 acc
    tm = max(8, (usable - fixed) // per_row)
    tm = min(tm, 4096, _round_up(m_total, 8))
    if want_parallel and m_total >= 16:
        # >= 2 grid steps so both v7x TensorCores get work.
        tm = min(tm, _round_up(pl.cdiv(m_total, 2), 8))
    return max(8, (tm // 8) * 8)


def _pick_h_tile(n, h, w, cin_p, cout_p, vmem_budget, want_parallel):
    """Output rows per grid step for the per-tap path (input tile carries a 2-row halo)."""
    usable = vmem_budget // 2
    w_sub = _round_up(w + 2, 16)                             # bf16 sublane rounding of (W+2)
    w_bytes = 9 * cin_p * cout_p * 2 + cout_p * 4            # resident weights + bias

    def step_bytes(th):
        x_tile = (th + 2) * w_sub * cin_p * 2                # bf16 halo tile
        out_tile = th * w * cout_p * 2                       # bf16 output tile
        patch = th * w * 3 * cin_p * 2                       # in-kernel concat temp
        acc = th * w * cout_p * 4                            # f32 accumulator
        return 2 * (x_tile + out_tile) + patch + acc + w_bytes

    th = 1
    for d in range(1, h + 1):                                # largest divisor of H that fits
        if h % d == 0 and step_bytes(d) <= usable:
            th = d
    if want_parallel and h > 1 and n * (h // th) < 2:
        for d in range(h // 2, 0, -1):                       # split H so >= 2 parallel steps
            if h % d == 0:
                th = min(th, d)
                break
    return th


def _im2col_kernel(x_ref, w_ref, b_ref, o_ref):
    # x_ref: (TM, K_p) bf16 im2col rows   w_ref: (K_p, Cout_p) bf16
    # b_ref: (1, Cout_p) f32              o_ref: (TM, Cout_p) bf16
    acc = jnp.dot(x_ref[...], w_ref[...], preferred_element_type=jnp.float32)
    o_ref[...] = jnp.maximum(acc + b_ref[...], 0.0).astype(o_ref.dtype)


def _make_tap_kernel(th, w, cin_p, cout_p):
    hw = th * w

    def kernel(x_ref, w_ref, b_ref, o_ref):
        # x_ref: (1, TH+2, W+2, Cin_p) bf16 halo tile
        # w_ref: (3, 3*Cin_p, Cout_p) bf16, indexed [kh, kw*Cin_p + cin, cout]
        # b_ref: (1, Cout_p) f32           o_ref: (1, TH*W, Cout_p) bf16
        acc = pl.broadcast_to(b_ref[...], (hw, cout_p))       # bias folded into acc init
        for kh in range(3):
            slab = x_ref[:, kh:kh + th, :, :]                 # (1, TH, W+2, Cin_p)
            patch = jnp.concatenate(
                [slab[:, :, kw:kw + w, :] for kw in range(3)], axis=-1
            ).reshape(hw, 3 * cin_p)                          # bf16, lane-dense
            acc = acc + jnp.dot(patch, w_ref[kh],
                                preferred_element_type=jnp.float32)
        o_ref[...] = jnp.maximum(acc, 0.0).reshape(1, hw, cout_p).astype(o_ref.dtype)

    return kernel


@jax.jit
def conv_relu(x_nchw, weight, bias):
    """3x3 conv (padding=1) + ReLU.  PyTorch layout: x (N,Cin,H,W), weight (Cout,Cin,3,3)."""
    N, Cin, H, W = x_nchw.shape
    Cout = weight.shape[0]
    Cout_p = _round_up(Cout, LANE)
    vmem_budget, want_parallel = _tpu_budget()
    compiler_params = pltpu.CompilerParams(
        dimension_semantics=("parallel",),
        vmem_limit_bytes=vmem_budget,
    )
    b_row = jnp.pad(bias.astype(jnp.float32), (0, Cout_p - Cout)).reshape(1, Cout_p)

    if Cin <= _SMALL_CIN_MAX:
        # ---------- small-Cin path: im2col, one lane-dense dot per step ----------
        K = 9 * Cin
        K_p = _round_up(K, LANE)
        M_total = N * H * W
        TM = _pick_m_tile(M_total, K_p, Cout_p, vmem_budget, want_parallel)
        M_p = _round_up(M_total, TM)

        x_nhwc = jnp.transpose(x_nchw, (0, 2, 3, 1)).astype(jnp.bfloat16)
        x_sp = jnp.pad(x_nhwc, ((0, 0), (1, 1), (1, 1), (0, 0)))
        patches = jnp.concatenate(
            [x_sp[:, kh:kh + H, kw:kw + W, :] for kh in range(3) for kw in range(3)],
            axis=-1).reshape(M_total, K)
        patches = jnp.pad(patches, ((0, M_p - M_total), (0, K_p - K)))

        w_mat = jnp.transpose(weight, (2, 3, 1, 0)).reshape(K, Cout)
        w_mat = jnp.pad(w_mat, ((0, K_p - K), (0, Cout_p - Cout))).astype(jnp.bfloat16)

        out = pl.pallas_call(
            _im2col_kernel,
            out_shape=jax.ShapeDtypeStruct((M_p, Cout_p), jnp.bfloat16),
            grid_spec=pltpu.PrefetchScalarGridSpec(
                num_scalar_prefetch=0,
                grid=(M_p // TM,),
                in_specs=[
                    pl.BlockSpec((TM, K_p), lambda m: (m, 0)),
                    # Constant index maps: fetched once, held across the whole grid.
                    pl.BlockSpec((K_p, Cout_p), lambda m: (0, 0)),
                    pl.BlockSpec((1, Cout_p), lambda m: (0, 0)),
                ],
                out_specs=pl.BlockSpec((TM, Cout_p), lambda m: (m, 0)),
            ),
            compiler_params=compiler_params,
        )(patches, w_mat, b_row)

        out = out[:M_total, :Cout].reshape(N, H, W, Cout)
    else:
        # ---------- large-Cin path: lane-dense channels, per-kh taps, H-halo tiles ----------
        Cin_p = _round_up(Cin, LANE)
        TH = _pick_h_tile(N, H, W, Cin_p, Cout_p, vmem_budget, want_parallel)
        n_h = H // TH

        x_nhwc = jnp.transpose(x_nchw, (0, 2, 3, 1)).astype(jnp.bfloat16)
        x_pad = jnp.pad(x_nhwc, ((0, 0), (1, 1), (1, 1), (0, Cin_p - Cin)))
        # Wrapper-built halo tiles: 2 duplicated rows per tile of TH output rows.
        tiles = jnp.stack(
            [x_pad[:, t * TH:t * TH + TH + 2] for t in range(n_h)], axis=1
        ).reshape(N * n_h, TH + 2, W + 2, Cin_p)

        w_hwio = jnp.transpose(weight, (2, 3, 1, 0))
        w_pad = jnp.pad(w_hwio, ((0, 0), (0, 0), (0, Cin_p - Cin), (0, Cout_p - Cout)))
        w_folded = w_pad.reshape(3, 3 * Cin_p, Cout_p).astype(jnp.bfloat16)

        out = pl.pallas_call(
            _make_tap_kernel(TH, W, Cin_p, Cout_p),
            out_shape=jax.ShapeDtypeStruct((N * n_h, TH * W, Cout_p), jnp.bfloat16),
            grid_spec=pltpu.PrefetchScalarGridSpec(
                num_scalar_prefetch=0,
                grid=(N * n_h,),
                in_specs=[
                    pl.BlockSpec((1, TH + 2, W + 2, Cin_p), lambda t: (t, 0, 0, 0)),
                    pl.BlockSpec((3, 3 * Cin_p, Cout_p), lambda t: (0, 0, 0)),
                    pl.BlockSpec((1, Cout_p), lambda t: (0, 0)),
                ],
                out_specs=pl.BlockSpec((1, TH * W, Cout_p), lambda t: (t, 0, 0)),
            ),
            compiler_params=compiler_params,
        )(tiles, w_folded, b_row)

        out = out[:, :, :Cout].reshape(N, n_h, TH, W, Cout).reshape(N, H, W, Cout)

    return jnp.transpose(out, (0, 3, 1, 2)).astype(x_nchw.dtype)


def _reference(x, weight, bias):
    # Same bf16-quantized operands as the MXU path, f32 conv, f32 bias + ReLU.
    xq = x.astype(jnp.bfloat16).astype(jnp.float32)
    wq = weight.astype(jnp.bfloat16).astype(jnp.float32)
    out = lax.conv_general_dilated(
        xq, wq, window_strides=(1, 1), padding=((1, 1), (1, 1)),
        dimension_numbers=("NCHW", "OIHW", "NCHW"),
        preferred_element_type=jnp.float32,
    ) + bias.reshape(1, -1, 1, 1)
    return jnp.maximum(out, 0.0)


if __name__ == "__main__":
    key = jax.random.PRNGKey(0)

    # --- primary check: ConvRelu(4, 8) on x (2, 4, 16, 16)  -> small-Cin / im2col path ---
    k_x, k_w, k_b, key = jax.random.split(key, 4)
    N, Cin, Cout, H, W = 2, 4, 8, 16, 16
    bound = 1.0 / ((Cin * 9) ** 0.5)  # nn.Conv2d default init range
    x = jax.random.normal(k_x, (N, Cin, H, W), dtype=jnp.float32)
    w = jax.random.uniform(k_w, (Cout, Cin, 3, 3), jnp.float32, -bound, bound)
    b = jax.random.uniform(k_b, (Cout,), jnp.float32, -bound, bound)

    out = jax.block_until_ready(conv_relu(x, w, b))
    ref = _reference(x, w, b)
    assert out.shape == (N, Cout, H, W) and out.dtype == x.dtype
    err = float(jnp.max(jnp.abs(out - ref)))
    assert jnp.allclose(out, ref, atol=2e-2, rtol=2e-2), err  # bf16 output rounding

    # --- secondary check: large-Cin (per-tap, H-halo-tiled) path stays correct ---
    k_x, k_w, k_b, key = jax.random.split(key, 4)
    N2, Cin2, Cout2, H2, W2 = 1, 40, 8, 8, 8
    bound2 = 1.0 / ((Cin2 * 9) ** 0.5)
    x2 = jax.random.normal(k_x, (N2, Cin2, H2, W2), dtype=jnp.float32)
    w2 = jax.random.uniform(k_w, (Cout2, Cin2, 3, 3), jnp.float32, -bound2, bound2)
    b2 = jax.random.uniform(k_b, (Cout2,), jnp.float32, -bound2, bound2)

    out2 = jax.block_until_ready(conv_relu(x2, w2, b2))
    ref2 = _reference(x2, w2, b2)
    err2 = float(jnp.max(jnp.abs(out2 - ref2)))
    assert out2.shape == (N2, Cout2, H2, W2)
    assert jnp.allclose(out2, ref2, atol=2e-2, rtol=2e-2), err2

    print("KERNEL_OK")
</pallas_src>

<mosaic_0001>
module attributes {stable_mosaic.version = 11 : i64} {
  func.func @_im2col_kernel(%arg0: i32, %arg1: memref<256x128xbf16, #tpu.memory_space<vmem>>, %arg2: memref<128x128xbf16, #tpu.memory_space<vmem>>, %arg3: memref<1x128xf32, #tpu.memory_space<vmem>>, %arg4: memref<256x128xbf16, #tpu.memory_space<vmem>>) attributes {dimension_semantics = [#tpu.dimension_semantics<parallel>], iteration_bounds = array<i64: 2>, scalar_prefetch = 0 : i64, scratch_operands = 0 : i64, tpu.core_type = #tpu.core_type<tc>, window_params = [{transform_indices = @transform_0, window_bounds = array<i64: 256, 128>}, {pipeline_mode = #tpu.pipeline_mode<synchronous>, transform_indices = @transform_1, window_bounds = array<i64: 128, 128>}, {pipeline_mode = #tpu.pipeline_mode<synchronous>, transform_indices = @transform_2, window_bounds = array<i64: 1, 128>}, {transform_indices = @transform_3, window_bounds = array<i64: 256, 128>}]} {
    %c0 = arith.constant 0 : index
    %c0_0 = arith.constant 0 : index
    %0 = vector.load %arg1[%c0, %c0_0] : memref<256x128xbf16, #tpu.memory_space<vmem>>, vector<256x128xbf16>
    %c0_1 = arith.constant 0 : index
    %c0_2 = arith.constant 0 : index
    %1 = vector.load %arg2[%c0_1, %c0_2] : memref<128x128xbf16, #tpu.memory_space<vmem>>, vector<128x128xbf16>
    %cst = arith.constant dense<0.000000e+00> : vector<256x128xf32>
    %2 = tpu.matmul %0, %1, %cst {dimension_numbers = #tpu.dot_dimension_numbers<[1], [0], [0], [1], [0, 0, 1, 1], [], []>} : vector<256x128xbf16>, vector<128x128xbf16>, vector<256x128xf32> -> vector<256x128xf32>
    %c0_3 = arith.constant 0 : index
    %c0_4 = arith.constant 0 : index
    %3 = vector.load %arg3[%c0_3, %c0_4] : memref<1x128xf32, #tpu.memory_space<vmem>>, vector<1x128xf32>
    %4 = vector.broadcast %3 : vector<1x128xf32> to vector<256x128xf32>
    %5 = arith.addf %2, %4 : vector<256x128xf32>
    %cst_5 = arith.constant 0.000000e+00 : f32
    %6 = vector.broadcast %cst_5 : f32 to vector<256x128xf32>
    %7 = arith.maximumf %5, %6 : vector<256x128xf32>
    %8 = arith.truncf %7 : vector<256x128xf32> to vector<256x128xbf16>
    %c0_6 = arith.constant 0 : index
    %c0_7 = arith.constant 0 : index
    %9 = vector.load %arg4[%c0_6, %c0_7] : memref<256x128xbf16, #tpu.memory_space<vmem>>, vector<256x128xbf16>
    tpu.vector_store %arg4[%c0_6, %c0_7], %8 {strides = array<i32>} : memref<256x128xbf16, #tpu.memory_space<vmem>>, vector<256x128xbf16>,
    return
  }
  func.func @transform_0(%arg0: i32) -> (i32, i32) {
    %c0_i32 = arith.constant 0 : i32
    %c0_i32_0 = arith.constant 0 : i32
    return %arg0, %c0_i32 : i32, i32
  }
  func.func @transform_1(%arg0: i32) -> (i32, i32) {
    %c0_i32 = arith.constant 0 : i32
    %c0_i32_0 = arith.constant 0 : i32
    %c0_i32_1 = arith.constant 0 : i32
    return %c0_i32, %c0_i32_0 : i32, i32
  }
  func.func @transform_2(%arg0: i32) -> (i32, i32) {
    %c0_i32 = arith.constant 0 : i32
    %c0_i32_0 = arith.constant 0 : i32
    %c0_i32_1 = arith.constant 0 : i32
    return %c0_i32, %c0_i32_0 : i32, i32
  }
  func.func @transform_3(%arg0: i32) -> (i32, i32) {
    %c0_i32 = arith.constant 0 : i32
    %c0_i32_0 = arith.constant 0 : i32
    return %arg0, %c0_i32 : i32, i32
  }
}

</mosaic_0001>

<bundles_post_ra>
// kernel: conv_relu.1
= control target key start
LH: loop header
LB: loop body
LE: loop exit
PB: predicated region body
PF: predicated region fallthrough
CT: control target
= control target key end

     0   :  { %s1126_s12 = smov 0   ;;  %s1247_s0 = inlined_call_operand.vmem [shape: bf16[512,128], index: 0, kind: input, shape index: {}]   ;;  %s1248_s1 = inlined_call_operand.vmem [shape: bf16[128,128], index: 1, kind: input, shape index: {}]   ;;  %s1249_s2 = inlined_call_operand.vmem [shape: f32[1,128], index: 2, kind: input, shape index: {}]   ;;  %s1250_s3 = inlined_call_operand.vmem [shape: bf16[512,128], index: 3, kind: output, shape index: {}]  }
   0x1 LB: > { %s783_s13 = sadd.s32 4294967295, %s1104_s12   ;;  %p787_p0 = scmp.ge.s32.totalorder %s1104_s12, 1  ;;  %s1104_s12 = sphi %s1126_s12, %s13_s12  }
   0x2   : > { %p138_p1 = scmp.lt.s32.totalorder %s1104_s12, 3 }
   0x4   : > { %p139_p2 = pnand %p787_p0, %p138_p1 }
   0x5   : > { %v1074_v0 = vld [vmem:[%s1248_s1] sm:$0xff] (!%p139_p2)   ;;  %s788_s16 = sshll.u32 (!%p139_p2), %s783_s13, 5  ;;  %v1075_v1 = vld [vmem:[%s1248_s1 + $0x8] sm:$0xff] (!%p139_p2)   ;;  %v1076_v2 = vld [vmem:[%s1248_s1 + $0x10] sm:$0xff] (!%p139_p2)  }
   0x6   : > { %142 = sbr.rel (%p139_p2) target bundleno = 284 (0x11c), region = 32  ;;  %p163_p3 = scmp.lt.s32.totalorder (!%p139_p2), %s788_s16, 63  ;;  %1002 = vmatprep.subr.bf16.mxu0 (!%p139_p2), %v1074_v0  ;;  %1050 = vmatprep.subr.bf16.mxu1 (!%p139_p2), %v1074_v0  ;;  %v1077_v3 = vld [vmem:[%s1248_s1 + $0x18] sm:$0xff] (!%p139_p2)   ;;  %v1078_v6 = vld [vmem:[%s1248_s1 + $0x20] sm:$0xff] (!%p139_p2)   ;;  %v1079_v7 = vld [vmem:[%s1248_s1 + $0x28] sm:$0xff] (!%p139_p2)  }
   0x7   : > { %1003 = vmatpush3.bf16.msra.mxu0 (!%p139_p2), %v1074_v0  ;;  %1058 = vmatpush3.bf16.msra.mxu1 (!%p139_p2), %v1074_v0  ;;  %v1080_v8 = vld [vmem:[%s1248_s1 + $0x30] sm:$0xff] (!%p139_p2)   ;;  %v1081_v9 = vld [vmem:[%s1248_s1 + $0x38] sm:$0xff] (!%p139_p2)   ;;  %v1187_v24 = vld [vmem:[%s1249_s2] ss:$0 sm:$0xff] (!%p139_p2) }
   0x8   : > { %1004 = vmatprep.subr.bf16.mxu0 (!%p139_p2), %v1075_v1  ;;  %1051 = vmatprep.subr.bf16.mxu1 (!%p139_p2), %v1075_v1 }
   0xb   : > { %1005 = vmatpush3.bf16.msra.mxu0 (!%p139_p2), %v1075_v1  ;;  %1059 = vmatpush3.bf16.msra.mxu1 (!%p139_p2), %v1075_v1 }
   0xc   : > { %1006 = vmatprep.subr.bf16.mxu0 (!%p139_p2), %v1076_v2  ;;  %1052 = vmatprep.subr.bf16.mxu1 (!%p139_p2), %v1076_v2 }
   0xd   : > { %s1252_s16 = smov (!%p163_p3, %s788_s16), 63 }
   0xe   : > { %s789_s21 = sshll.u32 %s1252_s16, 2 }
   0xf   : > { %s1151_s24 = scalar_lea.vmem %s1247_s0, %s789_s21  ;;  %1007 = vmatpush3.bf16.msra.mxu0 %v1076_v2  ;;  %1060 = vmatpush3.bf16.msra.mxu1 %v1076_v2  ;;  %s1202_s13 = scalar_lea.vmem %s1250_s3, %s789_s21 }
  0x10   : > { %v1082_v4 = vld [vmem:[%s1151_s24] sm:$0xff]   ;;  %1008 = vmatprep.subr.bf16.mxu0 %v1077_v3  ;;  %1053 = vmatprep.subr.bf16.mxu1 %v1077_v3  ;;  %v1084_v10 = vld [vmem:[%s1151_s24 + $0x8] sm:$0xff]   ;;  %v1086_v12 = vld [vmem:[%s1151_s24 + $0x10] sm:$0xff]  }
  0x11   : > { %v1083_v5 = vld [vmem:[%s1151_s24 + $0x40] sm:$0xff]   ;;  %1018 = vmatprep.mubr.bf16.mxu0 %v1082_v4  ;;  %v1085_v11 = vld [vmem:[%s1151_s24 + $0x48] sm:$0xff]   ;;  %v1087_v13 = vld [vmem:[%s1151_s24 + $0x50] sm:$0xff]  }
  0x12   : > { %1034 = vmatprep.mubr.bf16.mxu1 %v1083_v5  ;;  %v1088_v14 = vld [vmem:[%s1151_s24 + $0x18] sm:$0xff]   ;;  %v1090_v16 = vld [vmem:[%s1151_s24 + $0x20] sm:$0xff]   ;;  %v1092_v18 = vld [vmem:[%s1151_s24 + $0x28] sm:$0xff]  }
  0x13   : > { %1009 = vmatpush3.bf16.msra.mxu0 %v1077_v3  ;;  %1061 = vmatpush3.bf16.msra.mxu1 %v1077_v3  ;;  %v1089_v15 = vld [vmem:[%s1151_s24 + $0x58] sm:$0xff]   ;;  %v1091_v17 = vld [vmem:[%s1151_s24 + $0x60] sm:$0xff]   ;;  %v1093_v19 = vld [vmem:[%s1151_s24 + $0x68] sm:$0xff]  }
  0x14   : > { %1010 = vmatprep.subr.bf16.mxu0 %v1078_v6  ;;  %1054 = vmatprep.subr.bf16.mxu1 %v1078_v6  ;;  %v1094_v20 = vld [vmem:[%s1151_s24 + $0x30] sm:$0xff]   ;;  %v1096_v22 = vld [vmem:[%s1151_s24 + $0x38] sm:$0xff]  }
  0x15   : > { %v1095_v21 = vld [vmem:[%s1151_s24 + $0x70] sm:$0xff]   ;;  %v1097_v23 = vld [vmem:[%s1151_s24 + $0x78] sm:$0xff]  }
  0x17   : > { %1011 = vmatpush3.bf16.msra.mxu0 %v1078_v6  ;;  %1062 = vmatpush3.bf16.msra.mxu1 %v1078_v6 }
  0x18   : > { %1012 = vmatprep.subr.bf16.mxu0 %v1079_v7  ;;  %1055 = vmatprep.subr.bf16.mxu1 %v1079_v7 }
  0x1b   : > { %1013 = vmatpush3.bf16.msra.mxu0 %v1079_v7  ;;  %1063 = vmatpush3.bf16.msra.mxu1 %v1079_v7 }
  0x1c   : > { %1014 = vmatprep.subr.bf16.mxu0 %v1080_v8  ;;  %1056 = vmatprep.subr.bf16.mxu1 %v1080_v8 }
  0x1f   : > { %1015 = vmatpush3.bf16.msra.mxu0 %v1080_v8  ;;  %1064 = vmatpush3.bf16.msra.mxu1 %v1080_v8 }
  0x20   : > { %1016 = vmatprep.subr.bf16.mxu0 %v1081_v9  ;;  %1057 = vmatprep.subr.bf16.mxu1 %v1081_v9 }
  0x23   : > { %1017 = vmatpush3.bf16.msra.mxu0 %v1081_v9  ;;  %1065 = vmatpush3.bf16.msra.mxu1 %v1081_v9 }
  0x26   : > { %1019 = vmatmul.mubr.bf16.vlgmr.msra.gmra.mrb[0].mxu0 %v1084_v10  ;;  %1035 = vmatmul.mubr.bf16.vlgmr.msra.gmra.mrb[0].mxu1 %v1085_v11 }
  0x27   : > { %1022 = vmatprep.mubr.bf16.mxu0 %v1086_v12  ;;  %1038 = vmatprep.mubr.bf16.mxu1 %v1087_v13 }
  0x2e   : > { %1023 = vmatmul.mubr.bf16.gmra.mrb[4].mxu0 %v1088_v14  ;;  %1039 = vmatmul.mubr.bf16.gmra.mrb[4].mxu1 %v1089_v15 }
  0x2f   : > { %1026 = vmatprep.mubr.bf16.mxu0 %v1090_v16  ;;  %1042 = vmatprep.mubr.bf16.mxu1 %v1091_v17 }
  0x36   : > { %1027 = vmatmul.mubr.bf16.gmra.mrb[8].mxu0 %v1092_v18  ;;  %1043 = vmatmul.mubr.bf16.gmra.mrb[8].mxu1 %v1093_v19 }
  0x37   : > { %1030 = vmatprep.mubr.bf16.mxu0 %v1094_v20  ;;  %1046 = vmatprep.mubr.bf16.mxu1 %v1095_v21 }
  0x3e   : > { %1031 = vmatmul.mubr.bf16.gmra.mrb[12].mxu0 %v1096_v22  ;;  %1047 = vmatmul.mubr.bf16.gmra.mrb[12].mxu1 %v1097_v23 }
  0xf9   : > { %v1020_v25 = vpop.f32.mrb[0].mxu0  ;;  %v1036_v26 = vpop.f32.mrb[0].mxu1 }
  0xfa   : > { %v417_v27 = vadd.f32 %v1020_v25, %v1187_v24  ;;  %v481_v28 = vadd.f32 %v1036_v26, %v1187_v24  ;;  %v408_v29 = vpop.f32.mrb[1].mxu0  ;;  %v472_v30 = vpop.f32.mrb[1].mxu1 }
  0xfb   : > { %v409_v31 = vadd.f32 %v1187_v24, %v408_v29  ;;  %v473_v32 = vadd.f32 %v1187_v24, %v472_v30  ;;  %v1021_v33 = vpop.f32.mrb[2].mxu0  ;;  %v1037_v34 = vpop.f32.mrb[2].mxu1 }
  0xfc   : > { %v420_v35 = vadd.f32 %v1021_v33, %v1187_v24  ;;  %v484_v36 = vadd.f32 %v1037_v34, %v1187_v24  ;;  %v411_v37 = vpop.f32.mrb[3].mxu0  ;;  %v475_v38 = vpop.f32.mrb[3].mxu1  ;;  %v537_v41 = vmax.f32 %v417_v27, 0.0  ;;  %v553_v42 = vmax.f32 %v481_v28, 0.0 }
  0xfd   : > { %v412_v39 = vadd.f32 %v1187_v24, %v411_v37  ;;  %v476_v40 = vadd.f32 %v1187_v24, %v475_v38  ;;  %v535_v45 = vmax.f32 %v409_v31, 0.0  ;;  %v551_v46 = vmax.f32 %v473_v32, 0.0 }
  0xfe   : > { %v538_v43 = vmax.f32 %v420_v35, 0.0  ;;  %v554_v44 = vmax.f32 %v484_v36, 0.0 }
  0xff   : > { %v536_v47 = vmax.f32 %v412_v39, 0.0  ;;  %v552_v48 = vmax.f32 %v476_v40, 0.0 }
 0x100   : > { %v891_v49 = vpack.c.bf16 %v538_v43, %v537_v41  ;;  %v931_v50 = vpack.c.bf16 %v554_v44, %v553_v42 }
 0x101   : > { %v886_v51 = vpack.c.bf16 %v536_v47, %v535_v45  ;;  %v926_v52 = vpack.c.bf16 %v552_v48, %v551_v46  ;;  %v1024_v53 = vpop.f32.mrb[4].mxu0  ;;  %v1040_v54 = vpop.f32.mrb[4].mxu1 }
 0x102   : > { %963 = vst [vmem:[%s1202_s13 + $0x8] sm:$0xff] %v891_v49   ;;  %971 = vst [vmem:[%s1202_s13 + $0x48] sm:$0xff] %v931_v50   ;;  %v433_v55 = vadd.f32 %v1024_v53, %v1187_v24  ;;  %v497_v56 = vadd.f32 %v1040_v54, %v1187_v24  ;;  %v424_v57 = vpop.f32.mrb[5].mxu0  ;;  %v488_v58 = vpop.f32.mrb[5].mxu1 }
 0x103   : > { %887 = vst [vmem:[%s1202_s13] sm:$0xff] %v886_v51   ;;  %970 = vst [vmem:[%s1202_s13 + $0x40] sm:$0xff] %v926_v52   ;;  %v425_v59 = vadd.f32 %v1187_v24, %v424_v57  ;;  %v489_v60 = vadd.f32 %v1187_v24, %v488_v58  ;;  %v1025_v61 = vpop.f32.mrb[6].mxu0  ;;  %v1041_v62 = vpop.f32.mrb[6].mxu1 }
 0x104   : > { %v436_v63 = vadd.f32 %v1025_v61, %v1187_v24  ;;  %v500_v0 = vadd.f32 %v1041_v62, %v1187_v24  ;;  %v427_v1 = vpop.f32.mrb[7].mxu0  ;;  %v491_v2 = vpop.f32.mrb[7].mxu1  ;;  %v541_v5 = vmax.f32 %v433_v55, 0.0  ;;  %v557_v6 = vmax.f32 %v497_v56, 0.0 }
 0x105   : > { %v428_v3 = vadd.f32 %v1187_v24, %v427_v1  ;;  %v492_v4 = vadd.f32 %v1187_v24, %v491_v2  ;;  %v539_v9 = vmax.f32 %v425_v59, 0.0  ;;  %v555_v10 = vmax.f32 %v489_v60, 0.0 }
 0x106   : > { %v542_v7 = vmax.f32 %v436_v63, 0.0  ;;  %v558_v8 = vmax.f32 %v500_v0, 0.0 }
 0x107   : > { %v540_v11 = vmax.f32 %v428_v3, 0.0  ;;  %v556_v12 = vmax.f32 %v492_v4, 0.0 }
 0x108   : > { %v901_v13 = vpack.c.bf16 %v542_v7, %v541_v5  ;;  %v941_v14 = vpack.c.bf16 %v558_v8, %v557_v6 }
 0x109   : > { %v896_v15 = vpack.c.bf16 %v540_v11, %v539_v9  ;;  %v936_v16 = vpack.c.bf16 %v556_v12, %v555_v10  ;;  %v1028_v17 = vpop.f32.mrb[8].mxu0  ;;  %v1044_v18 = vpop.f32.mrb[8].mxu1 }
 0x10a   : > { %965 = vst [vmem:[%s1202_s13 + $0x18] sm:$0xff] %v901_v13   ;;  %973 = vst [vmem:[%s1202_s13 + $0x58] sm:$0xff] %v941_v14   ;;  %v449_v19 = vadd.f32 %v1028_v17, %v1187_v24  ;;  %v513_v20 = vadd.f32 %v1044_v18, %v1187_v24  ;;  %v440_v21 = vpop.f32.mrb[9].mxu0  ;;  %v504_v22 = vpop.f32.mrb[9].mxu1 }
 0x10b   : > { %964 = vst [vmem:[%s1202_s13 + $0x10] sm:$0xff] %v896_v15   ;;  %972 = vst [vmem:[%s1202_s13 + $0x50] sm:$0xff] %v936_v16   ;;  %v441_v23 = vadd.f32 %v1187_v24, %v440_v21  ;;  %v505_v25 = vadd.f32 %v1187_v24, %v504_v22  ;;  %v1029_v26 = vpop.f32.mrb[10].mxu0  ;;  %v1045_v27 = vpop.f32.mrb[10].mxu1 }
 0x10c   : > { %v452_v28 = vadd.f32 %v1029_v26, %v1187_v24  ;;  %v516_v29 = vadd.f32 %v1045_v27, %v1187_v24  ;;  %v443_v30 = vpop.f32.mrb[11].mxu0  ;;  %v507_v31 = vpop.f32.mrb[11].mxu1  ;;  %v545_v34 = vmax.f32 %v449_v19, 0.0  ;;  %v561_v35 = vmax.f32 %v513_v20, 0.0 }
 0x10d   : > { %v444_v32 = vadd.f32 %v1187_v24, %v443_v30  ;;  %v508_v33 = vadd.f32 %v1187_v24, %v507_v31  ;;  %v543_v38 = vmax.f32 %v441_v23, 0.0  ;;  %v559_v39 = vmax.f32 %v505_v25, 0.0 }
 0x10e   : > { %v546_v36 = vmax.f32 %v452_v28, 0.0  ;;  %v562_v37 = vmax.f32 %v516_v29, 0.0 }
 0x10f   : > { %v544_v40 = vmax.f32 %v444_v32, 0.0  ;;  %v560_v41 = vmax.f32 %v508_v33, 0.0 }
 0x110   : > { %v911_v42 = vpack.c.bf16 %v546_v36, %v545_v34  ;;  %v951_v43 = vpack.c.bf16 %v562_v37, %v561_v35 }
 0x111   : > { %v906_v44 = vpack.c.bf16 %v544_v40, %v543_v38  ;;  %v946_v45 = vpack.c.bf16 %v560_v41, %v559_v39  ;;  %v1032_v46 = vpop.f32.mrb[12].mxu0  ;;  %v1048_v47 = vpop.f32.mrb[12].mxu1 }
 0x112   : > { %967 = vst [vmem:[%s1202_s13 + $0x28] sm:$0xff] %v911_v42   ;;  %975 = vst [vmem:[%s1202_s13 + $0x68] sm:$0xff] %v951_v43   ;;  %v465_v48 = vadd.f32 %v1032_v46, %v1187_v24  ;;  %v529_v49 = vadd.f32 %v1048_v47, %v1187_v24  ;;  %v456_v50 = vpop.f32.mrb[13].mxu0  ;;  %v520_v51 = vpop.f32.mrb[13].mxu1 }
 0x113   : > { %966 = vst [vmem:[%s1202_s13 + $0x20] sm:$0xff] %v906_v44   ;;  %974 = vst [vmem:[%s1202_s13 + $0x60] sm:$0xff] %v946_v45   ;;  %v457_v52 = vadd.f32 %v1187_v24, %v456_v50  ;;  %v521_v53 = vadd.f32 %v1187_v24, %v520_v51  ;;  %v1033_v54 = vpop.f32.mrb[14].mxu0  ;;  %v1049_v55 = vpop.f32.mrb[14].mxu1 }
 0x114   : > { %v468_v56 = vadd.f32 %v1033_v54, %v1187_v24  ;;  %v532_v57 = vadd.f32 %v1049_v55, %v1187_v24  ;;  %v459_v58 = vpop.f32.mrb[15].mxu0  ;;  %v523_v59 = vpop.f32.mrb[15].mxu1  ;;  %v549_v62 = vmax.f32 %v465_v48, 0.0  ;;  %v565_v63 = vmax.f32 %v529_v49, 0.0 }
 0x115   : > { %v460_v60 = vadd.f32 %v1187_v24, %v459_v58  ;;  %v524_v61 = vadd.f32 %v1187_v24, %v523_v59  ;;  %v547_v2 = vmax.f32 %v457_v52, 0.0  ;;  %v563_v3 = vmax.f32 %v521_v53, 0.0 }
 0x116   : > { %v550_v0 = vmax.f32 %v468_v56, 0.0  ;;  %v566_v1 = vmax.f32 %v532_v57, 0.0 }
 0x117   : > { %v548_v4 = vmax.f32 %v460_v60, 0.0  ;;  %v564_v5 = vmax.f32 %v524_v61, 0.0 }
 0x118   : > { %v921_v6 = vpack.c.bf16 %v550_v0, %v549_v62  ;;  %v961_v7 = vpack.c.bf16 %v566_v1, %v565_v63 }
 0x119   : > { %v916_v8 = vpack.c.bf16 %v548_v4, %v547_v2  ;;  %v956_v9 = vpack.c.bf16 %v564_v5, %v563_v3 }
 0x11a   : > { %969 = vst [vmem:[%s1202_s13 + $0x38] sm:$0xff] %v921_v6   ;;  %977 = vst [vmem:[%s1202_s13 + $0x78] sm:$0xff] %v961_v7  }
 0x11b   : > { %968 = vst [vmem:[%s1202_s13 + $0x30] sm:$0xff] %v916_v8   ;;  %976 = vst [vmem:[%s1202_s13 + $0x70] sm:$0xff] %v956_v9  }
 0x11c PF: > { %s13_s12 = sadd.s32 1, %s1104_s12  }
 0x11d   : > { %p10_p4 = scmp.ge.s32.totalorder %s13_s12, 4  }
 0x11f   :  { %12 = sbr.rel (!%p10_p4) target bundleno = 1 (0x1), region = 62 }

</bundles_post_ra>
